<compile_context>
chip_gen: v7x
topology: tpu7x:2x2x1
jax: 0.10.0
libtpu: 0.0.40
codegen_flags: <defaults>
</compile_context>

<pallas_src>
import functools
import math

import jax
import jax.numpy as jnp
from jax.experimental import pallas as pl
from jax.experimental.pallas import tpu as pltpu


def mlp_kernel(x_ref, w1_ref, b1_ref, w2_ref, b2_ref, o_ref, *,
               row_chunk, n_chunks):
    # Hoist the (tiny, resident) weight / bias loads out of the chunk loop.
    w1 = w1_ref[...]
    b1 = b1_ref[...]
    w2 = w2_ref[...]
    b2 = b2_ref[...]

    # Process the batch block in row_chunk-row slices so the f32 intermediates
    # (h, logits, exp) stay small regardless of how large the DMA tile is.
    @pl.loop(0, n_chunks)
    def _(c):
        r0 = pl.multiple_of(c * row_chunk, row_chunk)
        xc = x_ref[pl.ds(r0, row_chunk), :]

        # Hidden layer: MXU matmul with f32 accumulation; bias + tanh in f32
        # on the VPU/EUP (v5e has no bf16 VPU/EUP path, so keep this in f32).
        h = jnp.dot(xc, w1, preferred_element_type=jnp.float32)
        h = jnp.tanh(h + b1)

        # Output layer: cast h to the weights' dtype so bf16 weights hit the
        # native bf16 MXU path (no-op for f32 weights); accumulate in f32.
        logits = jnp.dot(h.astype(w2.dtype), w2,
                         preferred_element_type=jnp.float32)
        logits = logits + b2

        # Numerically-stable log-softmax over the class axis (K = full last dim).
        m = jnp.max(logits, axis=-1, keepdims=True)
        shifted = logits - m
        lse = jnp.log(jnp.sum(jnp.exp(shifted), axis=-1, keepdims=True))
        o_ref[pl.ds(r0, row_chunk), :] = (shifted - lse).astype(o_ref.dtype)


def _round_up(x, m):
    return ((x + m - 1) // m) * m


def _choose_tile_b(B, F, H, K, *, x_dtype_bytes=4,
                   vmem_budget_bytes=24 * 1024 * 1024,
                   max_tile_b=4096, row_chunk=256):
    """Pick the batch tile from lane-padded VMEM arithmetic.

    Accounts for the (8,128) layout: the x tile occupies 128 lanes per row even
    though F=32, and the out tile 128 lanes even though K=8, so the real
    double-buffered cost is ~2 KiB per batch row (f32), not ~600 B.  The
    4096-row ceiling keeps the scoped-VMEM request comfortably under 32 MiB
    (v7x has 64 MiB physical VMEM); v5e/v6e (128 MiB) can sweep this higher.
    Also keeps >= 4 grid steps when B allows so v7x's two TensorCores get a
    balanced split of the "parallel" batch axis.
    """
    lane = 128

    def lp(n):  # lane padding of the last dim
        return _round_up(n, lane)

    # Resident weights/biases (double-buffered by the pipeline), lane-padded.
    weight_bytes = 2 * 4 * (_round_up(F, 8) * lp(H) + 8 * lp(H)
                            + _round_up(H, 8) * lp(K) + 8 * lp(K))
    # Chunked f32 intermediates (h, tanh, logits/exp) for one row_chunk slice.
    chunk_bytes = row_chunk * 4 * (2 * lp(H) + 3 * lp(K))
    # Per batch row: double-buffered x tile + double-buffered f32 out tile.
    per_row_bytes = 2 * x_dtype_bytes * lp(F) + 2 * 4 * lp(K)

    avail = max(0, vmem_budget_bytes - weight_bytes - chunk_bytes)
    tile = min(max_tile_b, max(8, avail // per_row_bytes))
    # Prefer >= 4 grid steps once B is large enough (balanced megacore split).
    tile = min(tile, max(8, _round_up(pl.cdiv(B, 4), 8)))
    # Align to the chunk size (or sublanes when the tile is small).
    if tile >= row_chunk:
        tile = (tile // row_chunk) * row_chunk
    else:
        tile = max(8, (tile // 8) * 8)
    return int(tile)


def mlp_forward(x, w1, b1, w2, b2, *, tile_b=None, row_chunk=256,
                compute_dtype=None):
    """x: (B, F). w1: (F, H), b1: (1, H), w2: (H, K), b2: (1, K).

    `compute_dtype` (e.g. jnp.bfloat16) casts only the weights (tiny, one-time).
    For the HBM-bandwidth win on x, pass x already stored in bf16 upstream --
    casting it here would add a full extra HBM read+write of x.
    """
    B, F = x.shape
    H = w1.shape[1]
    K = w2.shape[1]

    if compute_dtype is not None:
        w1 = w1.astype(compute_dtype)
        w2 = w2.astype(compute_dtype)

    if tile_b is None:
        tile_b = _choose_tile_b(B, F, H, K, x_dtype_bytes=x.dtype.itemsize,
                                row_chunk=row_chunk)
    # Inner chunk must divide the tile; tile_b is always a multiple of 8.
    row_chunk = min(row_chunk, tile_b)
    if tile_b % row_chunk != 0:
        row_chunk = math.gcd(tile_b, row_chunk)
    n_chunks = tile_b // row_chunk

    # No jnp.pad: grid = cdiv(B, tile_b).  The last block may be partial; its
    # tail rows read stale VMEM and compute garbage, but Pallas only writes the
    # valid rows back to HBM and no reduction crosses the batch axis in-kernel.
    grid_b = pl.cdiv(B, tile_b)

    kernel = functools.partial(mlp_kernel, row_chunk=row_chunk,
                               n_chunks=n_chunks)

    return pl.pallas_call(
        kernel,
        out_shape=jax.ShapeDtypeStruct((B, K), jnp.float32),
        grid_spec=pltpu.PrefetchScalarGridSpec(
            num_scalar_prefetch=0,
            grid=(grid_b,),
            in_specs=[
                pl.BlockSpec((tile_b, F), lambda i: (i, 0)),   # x tile per step
                pl.BlockSpec((F, H), lambda i: (0, 0)),        # W1 (resident)
                pl.BlockSpec((1, H), lambda i: (0, 0)),        # b1
                pl.BlockSpec((H, K), lambda i: (0, 0)),        # W2 (resident)
                pl.BlockSpec((1, K), lambda i: (0, 0)),        # b2
            ],
            out_specs=pl.BlockSpec((tile_b, K), lambda i: (i, 0)),
        ),
        compiler_params=pltpu.CompilerParams(
            dimension_semantics=("parallel",),
            # 32 MiB scoped VMEM: enough for the 4096-row tile everywhere and
            # within v7x's 64 MiB physical VMEM.  Raise to 48-64 MiB on
            # v5e/v6e if sweeping tile_b to 8192.
            vmem_limit_bytes=32 * 1024 * 1024,
        ),
    )(x, w1, b1, w2, b2)


def reference_forward(x, w1, b1, w2, b2):
    h = jnp.tanh(x @ w1 + b1)
    logits = h @ w2 + b2
    return jax.nn.log_softmax(logits, axis=1)


if __name__ == "__main__":
    # TODO(synk): training (fit/AdamW/KLDiv), normalization statistics and the
    # numpy predict helpers are host-side logic, not part of the forward pass.

    # Shapes consistent with the module:
    #   num_features = 32, num_hiddens = 64, num_kernels = len(kernels) = 8.
    F, H, K = 32, 64, 8

    key = jax.random.PRNGKey(0)
    kx, k1, k2, k3, k4 = jax.random.split(key, 5)

    # PyTorch Linear weight is (out, in); stored pre-transposed here as (in, out)
    # so the kernel does row-major matmuls.
    w1 = jax.random.normal(k1, (F, H), dtype=jnp.float32) * 0.1
    b1 = jax.random.normal(k2, (1, H), dtype=jnp.float32) * 0.1
    w2 = jax.random.normal(k3, (H, K), dtype=jnp.float32) * 0.1
    b2 = jax.random.normal(k4, (1, K), dtype=jnp.float32) * 0.1

    # Case 1: B=16 -- auto tile (8 rows, 2 grid steps).
    B = 16
    x = jax.random.normal(kx, (B, F), dtype=jnp.float32)
    out = jax.block_until_ready(mlp_forward(x, w1, b1, w2, b2))
    ref = reference_forward(x, w1, b1, w2, b2)
    assert out.shape == (B, K)
    assert jnp.allclose(out, ref, atol=1e-5, rtol=1e-5), "mismatch (B=16)"

    # Case 2: B=20 -- batch not a multiple of the tile; exercises the
    # partial-boundary-block path (no jnp.pad copy of x).
    B2 = 20
    x2 = jax.random.normal(kx, (B2, F), dtype=jnp.float32)
    out2 = jax.block_until_ready(mlp_forward(x2, w1, b1, w2, b2))
    ref2 = reference_forward(x2, w1, b1, w2, b2)
    assert out2.shape == (B2, K)
    assert jnp.allclose(out2, ref2, atol=1e-5, rtol=1e-5), "mismatch (B=20)"

    # Case 3: B=600 with an explicit 512-row tile and 128-row inner chunks --
    # exercises the multi-chunk in-kernel loop, a multi-step grid, and a
    # partial last block together.
    B3 = 600
    x3 = jax.random.normal(kx, (B3, F), dtype=jnp.float32)
    out3 = jax.block_until_ready(
        mlp_forward(x3, w1, b1, w2, b2, tile_b=512, row_chunk=128))
    ref3 = reference_forward(x3, w1, b1, w2, b2)
    assert out3.shape == (B3, K)
    assert jnp.allclose(out3, ref3, atol=1e-5, rtol=1e-5), "mismatch (B=600)"

    print("KERNEL_OK")
</pallas_src>

<mosaic_0001>
module attributes {stable_mosaic.version = 11 : i64} {
  func.func @mlp_kernel(%arg0: i32, %arg1: memref<8x32xf32, #tpu.memory_space<vmem>>, %arg2: memref<32x64xf32, #tpu.memory_space<vmem>>, %arg3: memref<1x64xf32, #tpu.memory_space<vmem>>, %arg4: memref<64x8xf32, #tpu.memory_space<vmem>>, %arg5: memref<1x8xf32, #tpu.memory_space<vmem>>, %arg6: memref<8x8xf32, #tpu.memory_space<vmem>>) attributes {dimension_semantics = [#tpu.dimension_semantics<parallel>], iteration_bounds = array<i64: 2>, scalar_prefetch = 0 : i64, scratch_operands = 0 : i64, tpu.core_type = #tpu.core_type<tc>, window_params = [{transform_indices = @transform_0, window_bounds = array<i64: 8, 32>}, {pipeline_mode = #tpu.pipeline_mode<synchronous>, transform_indices = @transform_1, window_bounds = array<i64: 32, 64>}, {pipeline_mode = #tpu.pipeline_mode<synchronous>, transform_indices = @transform_2, window_bounds = array<i64: 1, 64>}, {pipeline_mode = #tpu.pipeline_mode<synchronous>, transform_indices = @transform_3, window_bounds = array<i64: 64, 8>}, {pipeline_mode = #tpu.pipeline_mode<synchronous>, transform_indices = @transform_4, window_bounds = array<i64: 1, 8>}, {transform_indices = @transform_5, window_bounds = array<i64: 8, 8>}]} {
    %c0 = arith.constant 0 : index
    %c0_0 = arith.constant 0 : index
    %0 = vector.load %arg2[%c0, %c0_0] : memref<32x64xf32, #tpu.memory_space<vmem>>, vector<32x64xf32>
    %c0_1 = arith.constant 0 : index
    %c0_2 = arith.constant 0 : index
    %1 = vector.load %arg3[%c0_1, %c0_2] : memref<1x64xf32, #tpu.memory_space<vmem>>, vector<1x64xf32>
    %c0_3 = arith.constant 0 : index
    %c0_4 = arith.constant 0 : index
    %2 = vector.load %arg4[%c0_3, %c0_4] : memref<64x8xf32, #tpu.memory_space<vmem>>, vector<64x8xf32>
    %c0_5 = arith.constant 0 : index
    %c0_6 = arith.constant 0 : index
    %3 = vector.load %arg5[%c0_5, %c0_6] : memref<1x8xf32, #tpu.memory_space<vmem>>, vector<1x8xf32>
    %c0_i32 = arith.constant 0 : i32
    %c1_i32 = arith.constant 1 : i32
    %4 = arith.muli %c0_i32, %c1_i32 : i32
    %c0_i32_7 = arith.constant 0 : i32
    %5 = arith.addi %c0_i32_7, %4 : i32
    %c8_i32 = arith.constant 8 : i32
    %6 = arith.muli %5, %c8_i32 : i32
    %7 = tpu.assume_multiple %6, 8 : i32
    %8 = arith.index_cast %7 : i32 to index
    %c0_8 = arith.constant 0 : index
    %9 = vector.load %arg1[%8, %c0_8] : memref<8x32xf32, #tpu.memory_space<vmem>>, vector<8x32xf32>
    %cst = arith.constant dense<0.000000e+00> : vector<8x64xf32>
    %10 = tpu.matmul %9, %0, %cst {dimension_numbers = #tpu.dot_dimension_numbers<[1], [0], [0], [1], [0, 0, 1, 1], [], []>} : vector<8x32xf32>, vector<32x64xf32>, vector<8x64xf32> -> vector<8x64xf32>
    %11 = vector.broadcast %1 : vector<1x64xf32> to vector<8x64xf32>
    %12 = arith.addf %10, %11 : vector<8x64xf32>
    %13 = math.tanh %12 : vector<8x64xf32>
    %cst_9 = arith.constant dense<0.000000e+00> : vector<8x8xf32>
    %14 = tpu.matmul %13, %2, %cst_9 {dimension_numbers = #tpu.dot_dimension_numbers<[1], [0], [0], [1], [0, 0, 1, 1], [], []>} : vector<8x64xf32>, vector<64x8xf32>, vector<8x8xf32> -> vector<8x8xf32>
    %15 = vector.broadcast %3 : vector<1x8xf32> to vector<8x8xf32>
    %16 = arith.addf %14, %15 : vector<8x8xf32>
    %cst_10 = arith.constant dense<0xFF800000> : vector<8xf32>
    %17 = vector.multi_reduction <maximumf>, %16, %cst_10 [1] : vector<8x8xf32> to vector<8xf32>
    %18 = vector.shape_cast %17 : vector<8xf32> to vector<8x1xf32>
    %19 = vector.broadcast %18 : vector<8x1xf32> to vector<8x8xf32>
    %20 = arith.subf %16, %19 : vector<8x8xf32>
    %21 = math.exp %20 : vector<8x8xf32>
    %cst_11 = arith.constant dense<0.000000e+00> : vector<8xf32>
    %22 = vector.multi_reduction <add>, %21, %cst_11 [1] : vector<8x8xf32> to vector<8xf32>
    %23 = vector.shape_cast %22 : vector<8xf32> to vector<8x1xf32>
    %24 = math.log %23 : vector<8x1xf32>
    %25 = vector.broadcast %24 : vector<8x1xf32> to vector<8x8xf32>
    %26 = arith.subf %20, %25 : vector<8x8xf32>
    %27 = arith.index_cast %7 : i32 to index
    %c0_12 = arith.constant 0 : index
    %28 = vector.load %arg6[%27, %c0_12] : memref<8x8xf32, #tpu.memory_space<vmem>>, vector<8x8xf32>
    tpu.vector_store %arg6[%27, %c0_12], %26 {strides = array<i32>} : memref<8x8xf32, #tpu.memory_space<vmem>>, vector<8x8xf32>,
    %c1_i32_13 = arith.constant 1 : i32
    return
  }
  func.func @transform_0(%arg0: i32) -> (i32, i32) {
    %c0_i32 = arith.constant 0 : i32
    %c0_i32_0 = arith.constant 0 : i32
    return %arg0, %c0_i32 : i32, i32
  }
  func.func @transform_1(%arg0: i32) -> (i32, i32) {
    %c0_i32 = arith.constant 0 : i32
    %c0_i32_0 = arith.constant 0 : i32
    %c0_i32_1 = arith.constant 0 : i32
    return %c0_i32, %c0_i32_0 : i32, i32
  }
  func.func @transform_2(%arg0: i32) -> (i32, i32) {
    %c0_i32 = arith.constant 0 : i32
    %c0_i32_0 = arith.constant 0 : i32
    %c0_i32_1 = arith.constant 0 : i32
    return %c0_i32, %c0_i32_0 : i32, i32
  }
  func.func @transform_3(%arg0: i32) -> (i32, i32) {
    %c0_i32 = arith.constant 0 : i32
    %c0_i32_0 = arith.constant 0 : i32
    %c0_i32_1 = arith.constant 0 : i32
    return %c0_i32, %c0_i32_0 : i32, i32
  }
  func.func @transform_4(%arg0: i32) -> (i32, i32) {
    %c0_i32 = arith.constant 0 : i32
    %c0_i32_0 = arith.constant 0 : i32
    %c0_i32_1 = arith.constant 0 : i32
    return %c0_i32, %c0_i32_0 : i32, i32
  }
  func.func @transform_5(%arg0: i32) -> (i32, i32) {
    %c0_i32 = arith.constant 0 : i32
    %c0_i32_0 = arith.constant 0 : i32
    return %arg0, %c0_i32 : i32, i32
  }
}

</mosaic_0001>

<bundles_post_ra>
// kernel: tpu_custom_call.1
= control target key start
LH: loop header
LB: loop body
LE: loop exit
PB: predicated region body
PF: predicated region fallthrough
CT: control target
= control target key end

     0   :  { %s596_s18 = smov 0   ;;  %s665_s0 = inlined_call_operand.vmem [shape: f32[16,32], index: 0, kind: input, shape index: {}]   ;;  %s666_s1 = inlined_call_operand.vmem [shape: f32[32,64], index: 1, kind: input, shape index: {}]   ;;  %s667_s2 = inlined_call_operand.vmem [shape: f32[1,64], index: 2, kind: input, shape index: {}]   ;;  %s668_s3 = inlined_call_operand.vmem [shape: f32[64,8], index: 3, kind: input, shape index: {}]   ;;  %s669_s4 = inlined_call_operand.vmem [shape: f32[1,8], index: 4, kind: input, shape index: {}]   ;;  %s670_s5 = inlined_call_operand.vmem [shape: f32[16,8], index: 5, kind: output, shape index: {}]  }
   0x1 LB: > { %s463_s19 = sadd.s32 4294967295, %s561_s18   ;;  %p467_p0 = scmp.ge.s32.totalorder %s561_s18, 1  ;;  %s561_s18 = sphi %s596_s18, %s15_s18  }
   0x2   : > { %p186_p1 = scmp.lt.s32.totalorder %s561_s18, 3 }
   0x4   : > { %p187_p2 = pnand %p467_p0, %p186_p1 }
   0x5   : > { %v220_v0 = vld [vmem:[%s666_s1] sm:$0xff] (!%p187_p2)  ;;  %v221_v1 = vld [vmem:[%s666_s1 + $0x8] sm:$0xff] (!%p187_p2)  ;;  %v222_v2 = vld [vmem:[%s666_s1 + $0x10] sm:$0xff] (!%p187_p2)  ;;  %v563_v3 = vmov (!%p187_p2), 0.0|0.0   ;;  %vm564_vm0 = vmmov (!%p187_p2), 0   ;;  %v565_v6 = vmov (!%p187_p2), 0.0  }
   0x6   : > { %190 = sbr.rel (%p187_p2) target bundleno = 773 (0x305), region = 40  ;;  %520 = vmatprep.subr.bf16.mxu0 (!%p187_p2), %v563_v3  ;;  %v521_v4 = vpack.c.bf16 (!%p187_p2), %v221_v1, %v220_v0  ;;  %v223_v5 = vld [vmem:[%s666_s1 + $0x18] sm:$0xff] (!%p187_p2)  ;;  %498 = vmatprep.mubr.msk.f32.mxu0 (!%p187_p2), %vm564_vm0, %v565_v6  ;;  %p212_p3 = scmp.lt.s32.totalorder (!%p187_p2), %s463_s19, 1  ;;  %v225_v7 = vld [vmem:[%s668_s3] sm:$0xff] (!%p187_p2)  ;;  %v226_v8 = vld [vmem:[%s668_s3 + $0x8] sm:$0xff] (!%p187_p2)  ;;  %vm241_vm1 = vcmask (!%p187_p2), 261120  }
   0x7   : > { %526 = vmatprep.subr.bf16.mxu1 (!%p187_p2), %v563_v3  ;;  %v527_v9 = vpack.c.bf16 (!%p187_p2), %v226_v8, %v225_v7  ;;  %517 = vmatprep.mubr.msk.f32.mxu1 (!%p187_p2), %vm564_vm0, %v565_v6  ;;  %v524_v10 = vpack.c.bf16 (!%p187_p2), %v223_v5, %v222_v2  ;;  %v227_v12 = vld [vmem:[%s668_s3 + $0x10] sm:$0xff] (!%p187_p2)  ;;  %v228_v13 = vld [vmem:[%s668_s3 + $0x18] sm:$0xff] (!%p187_p2)  ;;  %v229_v15 = vld [vmem:[%s668_s3 + $0x20] sm:$0xff] (!%p187_p2)  ;;  %vm322_vm2 = vcmask (!%p187_p2), 523264   ;;  %vm396_vm3 = vcmask (!%p187_p2), 64512  }
   0x8   : > { %522 = vmatpush3.bf16.msra.mxu0 (!%p187_p2), %v521_v4  ;;  %v530_v14 = vpack.c.bf16 (!%p187_p2), %v228_v13, %v227_v12  ;;  %v230_v16 = vld [vmem:[%s668_s3 + $0x28] sm:$0xff] (!%p187_p2)  ;;  %v231_v18 = vld [vmem:[%s668_s3 + $0x30] sm:$0xff] (!%p187_p2)  ;;  %v232_v19 = vld [vmem:[%s668_s3 + $0x38] sm:$0xff] (!%p187_p2) }
   0x9   : > { %523 = vmatprep.subr.bf16.mxu0 (!%p187_p2), %v563_v3  ;;  %528 = vmatpush3.bf16.msra.mxu1 (!%p187_p2), %v527_v9  ;;  %v533_v17 = vpack.c.bf16 (!%p187_p2), %v230_v16, %v229_v15  ;;  %v536_v20 = vpack.c.bf16 (!%p187_p2), %v232_v19, %v231_v18  ;;  %v470_v21 = vld [vmem:[%s667_s2] ss:$0 sm:$0xff] (!%p187_p2) }
   0xa   : > { %529 = vmatprep.subr.bf16.mxu1 (!%p187_p2), %v563_v3  ;;  %v472_v26 = vld [vmem:[%s669_s4] ss:$0 sm:$0xff] (!%p187_p2) }
   0xc   : > { %525 = vmatpush3.bf16.msra.mxu0 (!%p187_p2), %v524_v10 }
   0xd   : > { %s672_s19 = smov (!%p212_p3, %s463_s19), 1  ;;  %531 = vmatpush3.bf16.msra.mxu1 %v530_v14 }
   0xe   : > { %s468_s7 = sshll.u32 %s672_s19, 3  ;;  %532 = vmatprep.subr.bf16.mxu1 %v563_v3 }
   0xf   : > { %s215_s10 = scalar_lea.vmem %s665_s0, %s468_s7  ;;  %s219_s6 = scalar_lea.vmem %s670_s5, %s468_s7 }
  0x10   : > { %v234_v11 = vld [vmem:[%s215_s10] sm:$0xff] }
  0x11   : > { %499 = vmatmul.mubr.msk.f32.vlgmr.msra.gmra.mrb[0].mxu0 %vm241_vm1, %v234_v11  ;;  %534 = vmatpush3.bf16.msra.mxu1 %v533_v17 }
  0x12   : > { %535 = vmatprep.subr.bf16.mxu1 %v563_v3 }
  0x15   : > { %537 = vmatpush3.bf16.msra.mxu1 %v536_v20 }
  0xe4   : > { %v311_v22 = vpop.f32.mrb[0].mxu0 }
  0xe5   : > { %v312_v23 = vadd.f32 %v470_v21, %v311_v22  ;;  %v500_v24 = vpop.f32.mrb[1].mxu0 }
  0xe7   : > { %549 = vtanh.f32 %v312_v23 }
  0xf1   : > { %v550_v25 = vpop.eup %549 }
  0xf2   : > { %518 = vmatmul.mubr.msk.f32.vlgmr.msra.gmra.mrb[0].mxu1 %vm322_vm2, %v550_v25 }
 0x1c5   : > { %v392_v27 = vpop.f32.mrb[0].mxu1 }
 0x1c6   : > { %v393_v28 = vadd.f32 %v472_v26, %v392_v27  ;;  %v519_v29 = vpop.f32.mrb[1].mxu1 }
 0x1c8   : > { %v397_v30 = vsel %vm396_vm3, %v393_v28, -inf }
 0x1c9   : > { %398 = vmax.xlane.f32.xlu0 %v397_v30 }
 0x256   : > { %v399_v31 = vpop.xlane.xlu0 %398 }
 0x257   : > { %v400_v32 = vsub.f32 %v393_v28, %v399_v31 }
 0x259   : > { %v401_v33 = vmul.f32 1.442695, %v400_v32 }
 0x25b   : > { %551 = vpow2.f32 %v401_v33 }
 0x265   : > { %v552_v34 = vpop.eup %551 }
 0x266   : > { %v403_v35 = vsel %vm396_vm3, %v552_v34, 0.0 }
 0x267   : > { %404 = vadd.xlane.f32.xlu0 %v403_v35 }
 0x2f4   : > { %v405_v36 = vpop.xlane.xlu0 %404 }
 0x2f5   : > { %553 = vlog2.f32 %v405_v36 }
 0x2ff   : > { %v554_v37 = vpop.eup %553 }
 0x300   : > { %v407_v38 = vmul.f32 0.6931472, %v554_v37 }
 0x302   : > { %v408_v39 = vsub.f32 %v400_v32, %v407_v38 }
 0x304   : > { %409 = vst.msk [vmem:[%s219_s6] sm:$0xff] %vm396_vm3, %v408_v39 }
 0x305 PF: > { %s15_s18 = sadd.s32 1, %s561_s18  }
 0x306   : > { %p12_p4 = scmp.ge.s32.totalorder %s15_s18, 4  }
 0x308   :  { %14 = sbr.rel (!%p12_p4) target bundleno = 1 (0x1), region = 70 }

</bundles_post_ra>
